<compile_context>
chip_gen: v6e
topology: v6e:2x2x1
jax: 0.10.0
libtpu: 0.0.40
codegen_flags: <defaults>
</compile_context>

<pallas_src>
import jax
import jax.numpy as jnp
from jax.experimental import pallas as pl
from jax.experimental.pallas import tpu as pltpu


# ---------------------------------------------------------------------------
# Pallas kernel: identity as one HBM -> HBM DMA (no grid, no VMEM staging).
# ---------------------------------------------------------------------------
def _dma_identity_kernel(x_hbm_ref, o_hbm_ref, sem):
    cp = pltpu.make_async_copy(x_hbm_ref, o_hbm_ref, sem)
    cp.start()
    cp.wait()


def _identity_dma_copy(x):
    """Materialize a fresh output buffer holding x, via a single async DMA."""
    if x.size == 0:
        return x
    nbytes = int(x.size) * jnp.dtype(x.dtype).itemsize
    return pl.pallas_call(
        _dma_identity_kernel,
        out_shape=jax.ShapeDtypeStruct(x.shape, x.dtype),
        in_specs=[pl.BlockSpec(memory_space=pl.ANY)],   # raw HBM ref, no auto-DMA
        out_specs=pl.BlockSpec(memory_space=pl.ANY),
        scratch_shapes=[pltpu.SemaphoreType.DMA(())],
        cost_estimate=pl.CostEstimate(
            flops=0, transcendentals=0, bytes_accessed=2 * nbytes),
    )(x)


# ---------------------------------------------------------------------------
# Module wrapper: Baseline.forward(x, edge_index) -> x
# ---------------------------------------------------------------------------
def baseline_forward(x, edge_index=None, *, materialize=False):
    """Identity forward. `edge_index` is unused by the reference module.

    Default path returns `x` directly — a genuinely zero-cost identity that
    lets XLA fuse neighbors. Set materialize=True to force a fresh output
    buffer produced by the Pallas HBM->HBM DMA copy kernel.
    """
    del edge_index  # unused by the reference module
    if materialize:
        return _identity_dma_copy(x)
    return x


if __name__ == "__main__":
    key = jax.random.PRNGKey(0)
    k_x, k_e = jax.random.split(key)

    # Small graph-style inputs: 16 nodes with 32 features, 24 edges.
    num_nodes, num_features, num_edges = 16, 32, 24
    x = jax.random.normal(k_x, (num_nodes, num_features), dtype=jnp.float32)
    edge_index = jax.random.randint(
        k_e, (2, num_edges), 0, num_nodes, dtype=jnp.int32)

    # Default path: zero-cost identity (no kernel launch, no copy).
    y0 = baseline_forward(x, edge_index)
    jax.block_until_ready(y0)
    assert y0.shape == x.shape and y0.dtype == x.dtype
    assert bool(jnp.all(y0 == x))

    # Pallas path: single HBM->HBM DMA identity copy.
    y1 = baseline_forward(x, edge_index, materialize=True)
    jax.block_until_ready(y1)
    assert y1.shape == x.shape and y1.dtype == x.dtype
    assert bool(jnp.all(y1 == x))

    print("KERNEL_OK")
</pallas_src>

<mosaic_0001>
module attributes {stable_mosaic.version = 11 : i64} {
  func.func @_dma_identity_kernel(%arg0: memref<16x32xf32, #tpu.memory_space<any>>, %arg1: memref<16x32xf32, #tpu.memory_space<any>>, %arg2: memref<!tpu.dma_semaphore, #tpu.memory_space<semaphore_mem>>) attributes {dimension_semantics = [], scalar_prefetch = 0 : i64, scratch_operands = 1 : i64, tpu.core_type = #tpu.core_type<tc>} {
    tpu.enqueue_dma source(%arg0 : memref<16x32xf32, #tpu.memory_space<any>>) target(%arg1 : memref<16x32xf32, #tpu.memory_space<any>>) target_semaphore(%arg2 : memref<!tpu.dma_semaphore, #tpu.memory_space<semaphore_mem>>)
    tpu.wait_dma2 semaphore(%arg2 : memref<!tpu.dma_semaphore, #tpu.memory_space<semaphore_mem>>) src(%arg0 : memref<16x32xf32, #tpu.memory_space<any>>) dst(%arg1 : memref<16x32xf32, #tpu.memory_space<any>>)
    return
  }
}

</mosaic_0001>

<bundles_post_ra>
// kernel: tpu_custom_call.1
= control target key start
LH: loop header
LB: loop body
LE: loop exit
PB: predicated region body
PF: predicated region fallthrough
CT: control target
= control target key end

     0   :  { %s28_s6 = smov [#allocation2]   ;;  %s29_s7 = smov 131072   ;;  %s47_s0 = inlined_call_operand.hbm [shape: f32[16,32], index: 0, kind: input, shape index: {}]   ;;  %s48_s1 = inlined_call_operand.hbm [shape: f32[16,32], index: 1, kind: output, shape index: {}]  }
   0x1   :  { %s30_s8 = smov 0  }
   0x2   :  { %12 = dma.general %s47_s0, 256, %s48_s1, %s28_s6, %s29_s7, [#allocation4], %s30_s8, 0  }
   0x3   :  { %26 = dma.done.wait [#allocation2], 256 }
   0x4   :  { %27 = vsyncadd [#allocation2], 4294967040 }
   0x5   :  { %16 = vsyncmov [#allocation2] }
   0x8   :  { %s17_s13 = vpop.sfrf %16 }
   0x9   :  { %p22_p0 = scmp.ne.s32.totalorder %s17_s13, 0 }
   0xb   :  { %21 = shalt.err (%p22_p0)  }

</bundles_post_ra>
